<compile_context>
chip_gen: v7x
topology: tpu7x:2x2x1
jax: 0.10.0
libtpu: 0.0.40
codegen_flags: <defaults>
</compile_context>

<pallas_src>
import functools

import jax
import jax.numpy as jnp
from jax.experimental import pallas as pl
from jax.experimental.pallas import tpu as pltpu

C_X = 4          # channels of x
C_COND = 4       # channels of condition
HIDDEN = 32      # cond_preproc hidden width
MAX_LANE_TILE = 8 * 1024   # lanes per grid step (multiple of 128)


def _cond_transform_kernel(x_ref, cond_ref, w1t_ref, b1_ref,
                           w2st_ref, b2st_ref, y_ref):
    # Stage 1: cond_preproc  ->  h = relu(W1^T @ cond + b1), shape (HIDDEN, N).
    # bf16 operands, f32 accumulation on the MXU.
    c16 = cond_ref[...].astype(jnp.bfloat16)
    h = jnp.dot(w1t_ref[...], c16,
                preferred_element_type=jnp.float32) + b1_ref[...]
    h16 = jnp.maximum(h, 0.0).astype(jnp.bfloat16)

    # Stage 2: fused conditioning net.  One (2*C_X, HIDDEN) stationary matmul
    # produces [s; t] stacked on sublanes; h is read from VMEM exactly once.
    # (+2.0 of sigmoid(s + 2) is pre-folded into the s rows of b2st.)
    st = jnp.dot(w2st_ref[...], h16,
                 preferred_element_type=jnp.float32) + b2st_ref[...]
    cx = y_ref.shape[0]
    s = st[:cx, :]          # sublane split -> free
    t = st[cx:, :]

    # Conditional affine transform: y = x * sigmoid(s) + t  (f32 epilogue).
    y_ref[...] = (x_ref[...] * jax.nn.sigmoid(s) + t).astype(y_ref.dtype)


def prepare_params(w1, b1, w2, b2, c_x=C_X):
    """One-time parameter prep (hoisted out of the per-call hot path)."""
    w1 = jnp.asarray(w1, jnp.float32)
    w2 = jnp.asarray(w2, jnp.float32)
    b1 = jnp.asarray(b1, jnp.float32).reshape(-1)
    b2 = jnp.asarray(b2, jnp.float32).reshape(-1)

    w1t = w1.T.astype(jnp.bfloat16)                          # (HIDDEN, C_COND)
    b1c = b1.reshape(-1, 1)                                  # (HIDDEN, 1) f32
    # Stack s-rows and t-rows into one (2*C_X, HIDDEN) stationary operand.
    w2st = jnp.concatenate([w2[:, :c_x].T, w2[:, c_x:].T],
                           axis=0).astype(jnp.bfloat16)      # (2*C_X, HIDDEN)
    # Fold the +2.0 of sigmoid(s + 2) into the s-bias rows.
    b2st = jnp.concatenate([b2[:c_x] + 2.0, b2[c_x:]]).reshape(-1, 1)  # (2C_X,1)
    return w1t, b1c, w2st, b2st


def _pick_lane_tile(n_round, batch, max_lane_tile):
    """Largest multiple of 128 that divides n_round and fits the cap; if B==1,
    keep >= 2 lane blocks so both v7x TensorCores get work."""
    m = n_round // 128
    max_d = max(1, min(m, max_lane_tile // 128))
    if batch == 1 and m >= 2:
        max_d = max(1, min(max_d, m // 2))
    d = max(dd for dd in range(1, max_d + 1) if m % dd == 0)
    return d * 128


def condition_transform_wrapper(x_nchw, cond_nchw, params,
                                max_lane_tile=MAX_LANE_TILE):
    """Forward pass. x_nchw: (B, C_X, H, W), cond_nchw: (B, C_COND, H, W)."""
    w1t, b1c, w2st, b2st = params
    B, Cx, H, W = x_nchw.shape
    Bc, Cc, Hc, Wc = cond_nchw.shape
    assert (B, H, W) == (Bc, Hc, Wc)
    N = H * W
    hidden = w1t.shape[0]
    c2x = w2st.shape[0]

    # NCHW is already channel-major: pure reshape, no HBM transpose.
    x_cn = x_nchw.reshape(B, Cx, N)
    c_cn = cond_nchw.reshape(B, Cc, N)

    # Lane tiling: tile divides round_up(N, 128) exactly, so padding is at
    # most 127 lanes (and zero when N is a multiple of 128).
    n_round = pl.cdiv(N, 128) * 128
    n_tile = _pick_lane_tile(n_round, B, max_lane_tile)
    n_pad = n_round - N
    if n_pad:
        x_cn = jnp.pad(x_cn, ((0, 0), (0, 0), (0, n_pad)))
        c_cn = jnp.pad(c_cn, ((0, 0), (0, 0), (0, n_pad)))

    grid = (B, n_round // n_tile)

    y_cn = pl.pallas_call(
        _cond_transform_kernel,
        out_shape=jax.ShapeDtypeStruct((B, Cx, n_round), x_cn.dtype),
        grid_spec=pltpu.PrefetchScalarGridSpec(
            num_scalar_prefetch=0,
            grid=grid,
            in_specs=[
                pl.BlockSpec((pl.Squeezed(), Cx, n_tile),
                             lambda b, n: (b, 0, n)),                 # x
                pl.BlockSpec((pl.Squeezed(), Cc, n_tile),
                             lambda b, n: (b, 0, n)),                 # condition
                pl.BlockSpec((hidden, Cc), lambda b, n: (0, 0)),      # w1^T (bf16)
                pl.BlockSpec((hidden, 1), lambda b, n: (0, 0)),       # b1
                pl.BlockSpec((c2x, hidden), lambda b, n: (0, 0)),     # [w2_s; w2_t]^T
                pl.BlockSpec((c2x, 1), lambda b, n: (0, 0)),          # [b2_s+2; b2_t]
            ],
            out_specs=pl.BlockSpec((pl.Squeezed(), Cx, n_tile),
                                   lambda b, n: (b, 0, n)),
        ),
        compiler_params=pltpu.CompilerParams(
            dimension_semantics=("parallel", "parallel")),
    )(x_cn, c_cn, w1t, b1c, w2st, b2st)

    if n_pad:
        y_cn = y_cn[:, :, :N]
    return y_cn.reshape(B, Cx, H, W)


def _reference(x_nchw, cond_nchw, w1, b1, w2, b2):
    """Pure-JAX f32 reference mirroring the PyTorch wrapper semantics."""
    B, Cx, H, W = x_nchw.shape
    Cc = cond_nchw.shape[1]
    c = jnp.transpose(cond_nchw, (0, 2, 3, 1)).reshape(-1, Cc)
    x = jnp.transpose(x_nchw, (0, 2, 3, 1)).reshape(-1, Cx)
    h = jnp.maximum(c @ w1 + b1, 0.0)            # cond_preproc
    st = h @ w2 + b2                             # module's conditioning net
    s, t = st[:, :Cx], st[:, Cx:]
    y = x * jax.nn.sigmoid(s + 2.0) + t
    return jnp.transpose(y.reshape(B, H, W, Cx), (0, 3, 1, 2))


if __name__ == "__main__":
    key = jax.random.PRNGKey(0)
    kx, kc, k1, k2, k3, k4 = jax.random.split(key, 6)

    B, H, W = 2, 16, 16
    x = jax.random.normal(kx, (B, C_X, H, W), dtype=jnp.float32)
    condition = jax.random.normal(kc, (B, C_COND, H, W), dtype=jnp.float32)

    # Deterministic synthetic parameters (1x1-conv weights as matrices).
    w1 = jax.random.normal(k1, (C_COND, HIDDEN), dtype=jnp.float32) * 0.1
    b1 = jax.random.normal(k2, (1, HIDDEN), dtype=jnp.float32) * 0.01
    w2 = jax.random.normal(k3, (HIDDEN, 2 * C_X), dtype=jnp.float32) * 0.1
    b2 = jax.random.normal(k4, (1, 2 * C_X), dtype=jnp.float32) * 0.01

    # Parameter prep done once, outside the hot path.
    params = prepare_params(w1, b1, w2, b2)
    fwd = jax.jit(functools.partial(condition_transform_wrapper, params=params))

    y = fwd(x, condition)
    y = jax.block_until_ready(y)

    y_ref = _reference(x, condition, w1, b1, w2, b2)
    assert y.shape == x.shape
    # bf16 matmul operands with f32 accumulation: loosen vs. the pure-f32 ref.
    assert jnp.allclose(y, y_ref, atol=3e-2, rtol=3e-2)

    # TODO(synk): `invert` path (module.invert) not exercised; it would be the
    # inverse affine (y - t) / sigmoid(s + 2) reusing the same cond kernel path.
    print("KERNEL_OK")
</pallas_src>

<mosaic_0001>
module attributes {stable_mosaic.version = 11 : i64} {
  func.func @_cond_transform_kernel(%arg0: i32, %arg1: i32, %arg2: memref<1x4x256xf32, #tpu.memory_space<vmem>>, %arg3: memref<1x4x256xf32, #tpu.memory_space<vmem>>, %arg4: memref<32x4xbf16, #tpu.memory_space<vmem>>, %arg5: memref<32x1xf32, #tpu.memory_space<vmem>>, %arg6: memref<8x32xbf16, #tpu.memory_space<vmem>>, %arg7: memref<8x1xf32, #tpu.memory_space<vmem>>, %arg8: memref<1x4x256xf32, #tpu.memory_space<vmem>>) attributes {dimension_semantics = [#tpu.dimension_semantics<parallel>, #tpu.dimension_semantics<parallel>], iteration_bounds = array<i64: 2, 1>, scalar_prefetch = 0 : i64, scratch_operands = 0 : i64, tpu.core_type = #tpu.core_type<tc>, window_params = [{transform_indices = @transform_0, window_bounds = array<i64: 1, 4, 256>}, {transform_indices = @transform_1, window_bounds = array<i64: 1, 4, 256>}, {pipeline_mode = #tpu.pipeline_mode<synchronous>, transform_indices = @transform_2, window_bounds = array<i64: 32, 4>}, {pipeline_mode = #tpu.pipeline_mode<synchronous>, transform_indices = @transform_3, window_bounds = array<i64: 32, 1>}, {pipeline_mode = #tpu.pipeline_mode<synchronous>, transform_indices = @transform_4, window_bounds = array<i64: 8, 32>}, {pipeline_mode = #tpu.pipeline_mode<synchronous>, transform_indices = @transform_5, window_bounds = array<i64: 8, 1>}, {transform_indices = @transform_6, window_bounds = array<i64: 1, 4, 256>}]} {
    %c0 = arith.constant 0 : index
    %c0_0 = arith.constant 0 : index
    %c0_1 = arith.constant 0 : index
    %0 = vector.load %arg3[%c0, %c0_0, %c0_1] : memref<1x4x256xf32, #tpu.memory_space<vmem>>, vector<1x4x256xf32>
    %1 = vector.shape_cast %0 : vector<1x4x256xf32> to vector<4x256xf32>
    %2 = arith.truncf %1 : vector<4x256xf32> to vector<4x256xbf16>
    %c0_2 = arith.constant 0 : index
    %c0_3 = arith.constant 0 : index
    %3 = vector.load %arg4[%c0_2, %c0_3] : memref<32x4xbf16, #tpu.memory_space<vmem>>, vector<32x4xbf16>
    %cst = arith.constant dense<0.000000e+00> : vector<32x256xf32>
    %4 = tpu.matmul %3, %2, %cst {dimension_numbers = #tpu.dot_dimension_numbers<[1], [0], [0], [1], [0, 0, 1, 1], [], []>} : vector<32x4xbf16>, vector<4x256xbf16>, vector<32x256xf32> -> vector<32x256xf32>
    %c0_4 = arith.constant 0 : index
    %c0_5 = arith.constant 0 : index
    %5 = vector.load %arg5[%c0_4, %c0_5] : memref<32x1xf32, #tpu.memory_space<vmem>>, vector<32x1xf32>
    %6 = vector.broadcast %5 : vector<32x1xf32> to vector<32x256xf32>
    %7 = arith.addf %4, %6 : vector<32x256xf32>
    %cst_6 = arith.constant 0.000000e+00 : f32
    %8 = vector.broadcast %cst_6 : f32 to vector<32x256xf32>
    %9 = arith.maximumf %7, %8 : vector<32x256xf32>
    %10 = arith.truncf %9 : vector<32x256xf32> to vector<32x256xbf16>
    %c0_7 = arith.constant 0 : index
    %c0_8 = arith.constant 0 : index
    %11 = vector.load %arg6[%c0_7, %c0_8] : memref<8x32xbf16, #tpu.memory_space<vmem>>, vector<8x32xbf16>
    %cst_9 = arith.constant dense<0.000000e+00> : vector<8x256xf32>
    %12 = tpu.matmul %11, %10, %cst_9 {dimension_numbers = #tpu.dot_dimension_numbers<[1], [0], [0], [1], [0, 0, 1, 1], [], []>} : vector<8x32xbf16>, vector<32x256xbf16>, vector<8x256xf32> -> vector<8x256xf32>
    %c0_10 = arith.constant 0 : index
    %c0_11 = arith.constant 0 : index
    %13 = vector.load %arg7[%c0_10, %c0_11] : memref<8x1xf32, #tpu.memory_space<vmem>>, vector<8x1xf32>
    %14 = vector.broadcast %13 : vector<8x1xf32> to vector<8x256xf32>
    %15 = arith.addf %12, %14 : vector<8x256xf32>
    %16 = vector.extract_strided_slice %15 {offsets = [0, 0], sizes = [4, 256], strides = [1, 1]} : vector<8x256xf32> to vector<4x256xf32>
    %17 = vector.extract_strided_slice %15 {offsets = [4, 0], sizes = [4, 256], strides = [1, 1]} : vector<8x256xf32> to vector<4x256xf32>
    %c0_12 = arith.constant 0 : index
    %c0_13 = arith.constant 0 : index
    %c0_14 = arith.constant 0 : index
    %18 = vector.load %arg2[%c0_12, %c0_13, %c0_14] : memref<1x4x256xf32, #tpu.memory_space<vmem>>, vector<1x4x256xf32>
    %19 = vector.shape_cast %18 : vector<1x4x256xf32> to vector<4x256xf32>
    %20 = arith.negf %16 : vector<4x256xf32>
    %21 = math.exp %20 : vector<4x256xf32>
    %cst_15 = arith.constant 1.000000e+00 : f32
    %22 = vector.broadcast %cst_15 : f32 to vector<4x256xf32>
    %23 = arith.addf %22, %21 : vector<4x256xf32>
    %24 = arith.divf %22, %23 : vector<4x256xf32>
    %25 = arith.mulf %19, %24 : vector<4x256xf32>
    %26 = arith.addf %25, %17 : vector<4x256xf32>
    %c0_16 = arith.constant 0 : index
    %c0_17 = arith.constant 0 : index
    %c0_18 = arith.constant 0 : index
    %27 = vector.load %arg8[%c0_16, %c0_17, %c0_18] : memref<1x4x256xf32, #tpu.memory_space<vmem>>, vector<1x4x256xf32>
    %28 = vector.shape_cast %27 : vector<1x4x256xf32> to vector<4x256xf32>
    %29 = vector.shape_cast %26 : vector<4x256xf32> to vector<1x4x256xf32>
    tpu.vector_store %arg8[%c0_16, %c0_17, %c0_18], %29 {strides = array<i32>} : memref<1x4x256xf32, #tpu.memory_space<vmem>>, vector<1x4x256xf32>,
    return
  }
  func.func @transform_0(%arg0: i32, %arg1: i32) -> (i32, i32, i32) {
    %c0_i32 = arith.constant 0 : i32
    %c0_i32_0 = arith.constant 0 : i32
    return %arg0, %c0_i32, %arg1 : i32, i32, i32
  }
  func.func @transform_1(%arg0: i32, %arg1: i32) -> (i32, i32, i32) {
    %c0_i32 = arith.constant 0 : i32
    %c0_i32_0 = arith.constant 0 : i32
    return %arg0, %c0_i32, %arg1 : i32, i32, i32
  }
  func.func @transform_2(%arg0: i32, %arg1: i32) -> (i32, i32) {
    %c0_i32 = arith.constant 0 : i32
    %c0_i32_0 = arith.constant 0 : i32
    %c0_i32_1 = arith.constant 0 : i32
    return %c0_i32, %c0_i32_0 : i32, i32
  }
  func.func @transform_3(%arg0: i32, %arg1: i32) -> (i32, i32) {
    %c0_i32 = arith.constant 0 : i32
    %c0_i32_0 = arith.constant 0 : i32
    %c0_i32_1 = arith.constant 0 : i32
    return %c0_i32, %c0_i32_0 : i32, i32
  }
  func.func @transform_4(%arg0: i32, %arg1: i32) -> (i32, i32) {
    %c0_i32 = arith.constant 0 : i32
    %c0_i32_0 = arith.constant 0 : i32
    %c0_i32_1 = arith.constant 0 : i32
    return %c0_i32, %c0_i32_0 : i32, i32
  }
  func.func @transform_5(%arg0: i32, %arg1: i32) -> (i32, i32) {
    %c0_i32 = arith.constant 0 : i32
    %c0_i32_0 = arith.constant 0 : i32
    %c0_i32_1 = arith.constant 0 : i32
    return %c0_i32, %c0_i32_0 : i32, i32
  }
  func.func @transform_6(%arg0: i32, %arg1: i32) -> (i32, i32, i32) {
    %c0_i32 = arith.constant 0 : i32
    %c0_i32_0 = arith.constant 0 : i32
    return %arg0, %c0_i32, %arg1 : i32, i32, i32
  }
}

</mosaic_0001>

<bundles_post_ra>
// kernel: condition_transform_wrapper.1
= control target key start
LH: loop header
LB: loop body
LE: loop exit
PB: predicated region body
PF: predicated region fallthrough
CT: control target
= control target key end

     0   :  { %s754_s21 = smov 0   ;;  %s756_s22 = smov 0   ;;  %s819_s0 = inlined_call_operand.vmem [shape: f32[2,4,256], index: 0, kind: input, shape index: {}]   ;;  %s820_s1 = inlined_call_operand.vmem [shape: f32[2,4,256], index: 1, kind: input, shape index: {}]   ;;  %s821_s2 = inlined_call_operand.vmem [shape: bf16[32,4], index: 2, kind: input, shape index: {}]   ;;  %s822_s3 = inlined_call_operand.vmem [shape: f32[32,1], index: 3, kind: input, shape index: {}]   ;;  %s823_s4 = inlined_call_operand.vmem [shape: bf16[8,32], index: 4, kind: input, shape index: {}]   ;;  %s824_s5 = inlined_call_operand.vmem [shape: f32[8,1], index: 5, kind: input, shape index: {}]   ;;  %s825_s6 = inlined_call_operand.vmem [shape: f32[2,4,256], index: 6, kind: output, shape index: {}]  }
   0x1   :  { %s758_s23 = smov 0  }
   0x2 LB: > { %s28_s24 = sadd.s32 1, %s712_s22  ;;  %p636_p0 = scmp.ge.s32.totalorder %s716_s23, 1  ;;  %s716_s23 = sphi %s758_s23, %s16_s23   ;;  %s712_s22 = sphi %s756_s22, %s827_s22   ;;  %s708_s21 = sphi %s754_s21, %s826_s21  }
   0x3   : > { %p30_p1 = scmp.ge.s32.totalorder %s28_s24, 2  ;;  %p250_p2 = scmp.lt.s32.totalorder %s716_s23, 3 }
   0x5   : > { %s829_s24 = smov (%p30_p1, %s28_s24), 0  ;;  %p251_p3 = pnand %p636_p0, %p250_p2 }
   0x6   : > { %p298_p4 = scmp.lt.s32.totalorder (!%p251_p3), %s708_s21, 1  ;;  %v718_v0 = vmov (!%p251_p3), 0   ;;  %v338_v1 = vld [vmem:[%s822_s3] sm:$0xff] (!%p251_p3)  ;;  %v340_v2 = vld [vmem:[%s822_s3 + $0x10] sm:$0xff] (!%p251_p3)  ;;  %v339_v3 = vld [vmem:[%s822_s3 + $0x8] sm:$0xff] (!%p251_p3)  ;;  %vm379_vm0 = vcmask (!%p251_p3), 1041408  }
   0x7   : > { %254 = sbr.rel (%p251_p3) target bundleno = 507 (0x1fb), region = 44  ;;  %418 = vmatprep.mubr.bf16.mxu0 (!%p251_p3), %v718_v0  ;;  %681 = vset.pattern.permute.xlu0 (!%p251_p3), %v718_v0  ;;  %v341_v4 = vld [vmem:[%s822_s3 + $0x18] sm:$0xff] (!%p251_p3)  ;;  %v452_v8 = vld [vmem:[%s824_s5] sm:$0xff] (!%p251_p3)  ;;  %vm372_vm1 = vcmask (!%p251_p3), 31744   ;;  %v685_v12 = vld [vmem:[%s821_s2 + $0x8] sm:$0xff] (!%p251_p3)   ;;  %vm458_vm2 = vcmask (!%p251_p3), 261120  }
   0x8   : > { %682 = vset.pattern.permute.xlu1 (!%p251_p3), %v718_v0  ;;  %494 = vmatprep.mubr.bf16.mxu1 (!%p251_p3), %v718_v0  ;;  %v684_v11 = vld [vmem:[%s821_s2] sm:$0xff] (!%p251_p3)  }
   0x9   : > { %344 = vperm.xlu0 (!%p251_p3), %681, %v338_v1   ;;  %354 = vperm.xlu1 (!%p251_p3), %682, %v340_v2   ;;  %v451_v45 = vld [vmem:[%s823_s4] sm:$0xf] (!%p251_p3) }
   0xd   : > { %349 = vperm.xlu0 (!%p251_p3), %681, %v339_v3   ;;  %359 = vperm.xlu1 (!%p251_p3), %682, %v341_v4  }
   0xe   : > { %s831_s21 = smov (!%p298_p4, %s708_s21), 1 }
   0xf   : > { %s778_s29 = sshll.u32 %s831_s21, 3 }
  0x10   : > { %s315_s10 = scalar_lea.vmem %s820_s1, %s778_s29  ;;  %s305_s26 = scalar_lea.vmem %s819_s0, %s778_s29 }
  0x11   : > { %v328_v5 = vld [vmem:[%s315_s10] sm:$0xff]  ;;  %455 = vperm.xlu0 %681, %v452_v8   ;;  %s325_s30 = scalar_lea.vmem %s825_s6, %s778_s29 }
  0x12   : > { %v330_v6 = vcombine.high %v328_v5, %v328_v5  ;;  %v332_v7 = vpack.c.bf16 %v328_v5, %v328_v5  ;;  %v503_v62 = vld [vmem:[%s305_s26] sm:$0xff] }
  0x14   : > { %v333_v9 = vpack.c.bf16 %v330_v6, %v330_v6  ;;  %v381_v10 = vsel %vm379_vm0, %v332_v7, 0 }
  0x16   : > { %645 = vmatprep.subr.msk.bf16.mxu0 %vm379_vm0, %v333_v9 }
  0x17   : > { %387 = vmatpush1.bf16.msra.mxu0 %v381_v10 }
  0x1a   : > { %646 = vmatmul.mubr.msk.bf16.vlgmr.msra.gmra.mrb[0].mxu0 %vm372_vm1, %v684_v11 }
  0x1b   : > { %428 = vmatprep.mubr.bf16.mxu0 %v718_v0 }
  0x22   : > { %647 = vmatmul.mubr.msk.bf16.gmra.mrb[4].mxu0 %vm372_vm1, %v685_v12 }
  0x88   : > { %v345_v13 = vpop.permute.xlu0 %344  ;;  %v355_v22 = vpop.permute.xlu1 %354 }
  0x8c   : > { %v350_v17 = vpop.permute.xlu0 %349  ;;  %v360_v33 = vpop.permute.xlu1 %359 }
  0x90   : > { %v456_v46 = vpop.permute.xlu0 %455 }
  0xed   : > { %v420_v14 = vpop.f32.mrb[0].mxu0 }
  0xee   : > { %v421_v15 = vadd.f32 %v420_v14, %v345_v13  ;;  %v422_v16 = vpop.f32.mrb[1].mxu0 }
  0xef   : > { %v423_v18 = vadd.f32 %v422_v16, %v345_v13  ;;  %v424_v19 = vpop.f32.mrb[2].mxu0 }
  0xf0   : > { %v425_v20 = vadd.f32 %v424_v19, %v350_v17  ;;  %v426_v21 = vpop.f32.mrb[3].mxu0  ;;  %v439_v24 = vmax.f32 %v421_v15, 0.0 }
  0xf1   : > { %v427_v23 = vadd.f32 %v426_v21, %v350_v17  ;;  %v440_v26 = vmax.f32 %v423_v18, 0.0 }
  0xf2   : > { %v441_v25 = vmax.f32 %v425_v20, 0.0 }
  0xf3   : > { %v442_v27 = vmax.f32 %v427_v23, 0.0 }
  0xf4   : > { %v447_v28 = vpack.c.bf16 %v441_v25, %v439_v24 }
  0xf5   : > { %v430_v29 = vpop.f32.mrb[4].mxu0  ;;  %v448_v30 = vpack.c.bf16 %v442_v27, %v440_v26 }
  0xf6   : > { %v431_v31 = vadd.f32 %v430_v29, %v355_v22  ;;  %v432_v32 = vpop.f32.mrb[5].mxu0 }
  0xf7   : > { %v433_v34 = vadd.f32 %v432_v32, %v355_v22  ;;  %v434_v35 = vpop.f32.mrb[6].mxu0  ;;  %462 = vmatprep.subr.bf16.mxu1 %v448_v30 }
  0xf8   : > { %v435_v36 = vadd.f32 %v434_v35, %v360_v33  ;;  %v436_v37 = vpop.f32.mrb[7].mxu0  ;;  %463 = vmatpush1.bf16.msra.mxu1 %v447_v28  ;;  %v443_v39 = vmax.f32 %v431_v31, 0.0 }
  0xf9   : > { %v437_v38 = vadd.f32 %v436_v37, %v360_v33  ;;  %v444_v41 = vmax.f32 %v433_v34, 0.0 }
  0xfa   : > { %v445_v40 = vmax.f32 %v435_v36, 0.0 }
  0xfb   : > { %v446_v42 = vmax.f32 %v437_v38, 0.0 }
  0xfc   : > { %v449_v43 = vpack.c.bf16 %v445_v40, %v443_v39 }
  0xfd   : > { %v450_v44 = vpack.c.bf16 %v446_v42, %v444_v41 }
  0xff   : > { %464 = vmatprep.subr.bf16.mxu1 %v450_v44 }
 0x100   : > { %465 = vmatpush1.bf16.msra.mxu1 %v449_v43 }
 0x103   : > { %648 = vmatmul.mubr.msk.bf16.vlgmr.msra.gmra.mrb[0].mxu1 %vm458_vm2, %v451_v45 }
 0x1d6   : > { %v496_v47 = vpop.f32.mrb[0].mxu1 }
 0x1d7   : > { %v497_v48 = vadd.f32 %v496_v47, %v456_v46  ;;  %v498_v49 = vpop.f32.mrb[1].mxu1 }
 0x1d8   : > { %v499_v50 = vadd.f32 %v498_v49, %v456_v46  ;;  %v500_v51 = vpop.f32.mrb[2].mxu1 }
 0x1d9   : > { %v649_v52 = vmul.f32 -1.442695, %v497_v48  ;;  %v501_v53 = vpop.f32.mrb[3].mxu1 }
 0x1da   : > { %v650_v54 = vmul.f32 -1.442695, %v499_v50  ;;  %v523_v55 = vcombine.high %v497_v48, %v499_v50 }
 0x1db   : > { %686 = vpow2.f32 %v649_v52 }
 0x1dc   : > { %688 = vpow2.f32 %v650_v54 }
 0x1e5   : > { %v687_v56 = vpop.eup %686 }
 0x1e6   : > { %v689_v57 = vpop.eup %688  ;;  %v510_v58 = vadd.f32 1.0, %v687_v56 }
 0x1e7   : > { %v511_v59 = vadd.f32 1.0, %v689_v57 }
 0x1e8   : > { %690 = vrcp.f32 %v510_v58 }
 0x1e9   : > { %692 = vrcp.f32 %v511_v59 }
 0x1f2   : > { %v691_v60 = vpop.eup %690 }
 0x1f3   : > { %v693_v61 = vpop.eup %692 }
 0x1f4   : > { %v518_v63 = vcombine.low %v691_v60, %v693_v61 }
 0x1f6   : > { %v520_v0 = vmul.f32 %v518_v63, %v503_v62 }
 0x1f8   : > { %v525_v1 = vadd.f32 %v523_v55, %v520_v0 }
 0x1fa   : > { %526 = vst [vmem:[%s325_s30] sm:$0xff] %v525_v1 }
 0x1fb PF: > { %s16_s23 = sadd.s32 1, %s716_s23   ;;  %s826_s21 = smov %s712_s22 }
 0x1fc   : > { %p13_p5 = scmp.ge.s32.totalorder %s16_s23, 4   ;;  %s827_s22 = smov %s829_s24 }
 0x1fe   :  { %15 = sbr.rel (!%p13_p5) target bundleno = 2 (0x2), region = 77 }

</bundles_post_ra>
